<compile_context>
chip_gen: v6e
topology: v6e:2x2x1
jax: 0.10.0
libtpu: 0.0.40
codegen_flags: <defaults>
</compile_context>

<pallas_src>
import functools
import math

import jax
import jax.numpy as jnp
from jax import lax
from jax.experimental import pallas as pl
from jax.experimental.pallas import tpu as pltpu


# ----------------------------------------------------------------------------
# helpers
# ----------------------------------------------------------------------------
def _pick_tile(dim, target, align):
    """Pick a tile size: full extent if small, else an `align`-multiple divisor <= target."""
    if dim <= target:
        return dim
    t = (target // align) * align
    while t >= align:
        if dim % t == 0:
            return t
        t -= align
    return dim  # fall back to full extent (always legal; vmem limit below will catch blowups)


def _vmem_limit(est_bytes):
    # Clamp: at least the 32 MiB scoped default, at most ~48 MiB so we stay inside
    # v7x's 64 MiB physical VMEM (v5e/v6e have 128 MiB so this is always safe).
    return int(min(max(est_bytes, 32 * 1024 * 1024), 48 * 1024 * 1024))


# ----------------------------------------------------------------------------
# kernel 1: tiled matmul + bias (+ optional ReLU)
# ----------------------------------------------------------------------------
def _matmul_bias_kernel(x_ref, w_ref, b_ref, o_ref, acc_ref, *, activation):
    k = pl.program_id(2)

    @pl.when(k == 0)
    def _():
        acc_ref[...] = jnp.zeros_like(acc_ref)

    # Inputs are already bf16 (pre-cast in the wrapper) -> native MXU, f32 accumulation.
    acc_ref[...] += jnp.dot(x_ref[...], w_ref[...], preferred_element_type=jnp.float32)

    @pl.when(k == pl.num_programs(2) - 1)
    def _():
        out = acc_ref[...] + b_ref[...].astype(jnp.float32)  # bias once per output tile
        if activation == "relu":
            out = jnp.maximum(out, 0.0)
        o_ref[...] = out.astype(o_ref.dtype)


def linear(x2, w_t, bias, *, activation=None, out_dtype=None,
           tm_target=256, tn_target=512, tk_target=512):
    """x2: (M, K); w_t: (K, N) (pre-transposed nn.Linear weight); bias: (N,) -> (M, N)."""
    # TODO(synk): sweep tm->512 / tk->1024 on v5e/v6e (128 MiB VMEM) for fewer grid steps.
    M, K = x2.shape
    K2, N = w_t.shape
    assert K == K2
    if out_dtype is None:
        out_dtype = x2.dtype
    tm = _pick_tile(M, tm_target, 8)
    tn = _pick_tile(N, tn_target, 128)
    tk = _pick_tile(K, tk_target, 128)
    b2 = bias.reshape(1, N)

    in_sz = jnp.dtype(x2.dtype).itemsize
    w_sz = jnp.dtype(w_t.dtype).itemsize
    o_sz = jnp.dtype(out_dtype).itemsize
    est = (2 * (tm * tk * in_sz + tk * tn * w_sz + tn * 4 + tm * tn * o_sz)
           + tm * tn * 4 + (4 << 20))

    kernel = functools.partial(_matmul_bias_kernel, activation=activation)

    return pl.pallas_call(
        kernel,
        out_shape=jax.ShapeDtypeStruct((M, N), out_dtype),
        grid_spec=pltpu.PrefetchScalarGridSpec(
            num_scalar_prefetch=0,
            # N-tiles major, M-tiles next, K (reduction) last.
            grid=(N // tn, M // tm, K // tk),
            in_specs=[
                pl.BlockSpec((tm, tk), lambda j, i, k: (i, k)),   # x rows
                pl.BlockSpec((tk, tn), lambda j, i, k: (k, j)),   # weight panel
                pl.BlockSpec((1, tn), lambda j, i, k: (0, j)),    # bias slice
            ],
            out_specs=pl.BlockSpec((tm, tn), lambda j, i, k: (i, j)),
            scratch_shapes=[pltpu.VMEM((tm, tn), jnp.float32)],
        ),
        compiler_params=pltpu.CompilerParams(
            dimension_semantics=("parallel", "parallel", "arbitrary"),
            vmem_limit_bytes=_vmem_limit(est),
        ),
    )(x2, w_t, b2)


# ----------------------------------------------------------------------------
# kernel 2: tiled matmul + bias fused with residual add + LayerNorm (full-width output)
# ----------------------------------------------------------------------------
def _matmul_bias_add_ln_kernel(x_ref, w_ref, b_ref, r_ref, g_ref, bb_ref,
                               o_ref, acc_ref, *, eps):
    k = pl.program_id(1)

    @pl.when(k == 0)
    def _():
        acc_ref[...] = jnp.zeros_like(acc_ref)

    acc_ref[...] += jnp.dot(x_ref[...], w_ref[...], preferred_element_type=jnp.float32)

    @pl.when(k == pl.num_programs(1) - 1)
    def _():
        # bias + residual + LayerNorm epilogue (full row of width D available: tn == D)
        z = acc_ref[...] + b_ref[...].astype(jnp.float32) + r_ref[...].astype(jnp.float32)
        mean = jnp.mean(z, axis=-1, keepdims=True)
        zc = z - mean
        var = jnp.mean(zc * zc, axis=-1, keepdims=True)
        inv = lax.rsqrt(var + eps)
        out = zc * inv * g_ref[...].astype(jnp.float32) + bb_ref[...].astype(jnp.float32)
        o_ref[...] = out.astype(o_ref.dtype)


def linear_add_ln(x2, w_t, bias, residual, gamma, beta, *, eps=1e-5, out_dtype=None,
                  tm_target=256, tk_target=512):
    """LayerNorm(residual + (x2 @ w_t + bias)) fused; output width = full N (= d_model)."""
    M, K = x2.shape
    K2, N = w_t.shape
    assert K == K2 and residual.shape == (M, N)
    if out_dtype is None:
        out_dtype = residual.dtype
    tm = _pick_tile(M, tm_target, 8)
    tk = _pick_tile(K, tk_target, 128)
    b2 = bias.reshape(1, N)
    g2 = gamma.reshape(1, N)
    bb2 = beta.reshape(1, N)

    in_sz = jnp.dtype(x2.dtype).itemsize
    w_sz = jnp.dtype(w_t.dtype).itemsize
    r_sz = jnp.dtype(residual.dtype).itemsize
    o_sz = jnp.dtype(out_dtype).itemsize
    est = (2 * (tm * tk * in_sz + tk * N * w_sz + 3 * N * 4
                + tm * N * r_sz + tm * N * o_sz)
           + tm * N * 4 + (4 << 20))

    kernel = functools.partial(_matmul_bias_add_ln_kernel, eps=eps)

    return pl.pallas_call(
        kernel,
        out_shape=jax.ShapeDtypeStruct((M, N), out_dtype),
        grid_spec=pltpu.PrefetchScalarGridSpec(
            num_scalar_prefetch=0,
            grid=(M // tm, K // tk),                              # reduction axis last
            in_specs=[
                pl.BlockSpec((tm, tk), lambda i, k: (i, k)),      # x rows
                pl.BlockSpec((tk, N), lambda i, k: (k, 0)),       # full-width weight panel
                pl.BlockSpec((1, N), lambda i, k: (0, 0)),        # bias
                pl.BlockSpec((tm, N), lambda i, k: (i, 0)),       # residual rows
                pl.BlockSpec((1, N), lambda i, k: (0, 0)),        # LN gamma
                pl.BlockSpec((1, N), lambda i, k: (0, 0)),        # LN beta
            ],
            out_specs=pl.BlockSpec((tm, N), lambda i, k: (i, 0)),
            scratch_shapes=[pltpu.VMEM((tm, N), jnp.float32)],
        ),
        compiler_params=pltpu.CompilerParams(
            dimension_semantics=("parallel", "arbitrary"),
            vmem_limit_bytes=_vmem_limit(est),
        ),
    )(x2, w_t, b2, residual, g2, bb2)


# ----------------------------------------------------------------------------
# kernel 3: per-batch multi-head attention on the fused QKV slab
# ----------------------------------------------------------------------------
def _attention_kernel(qkv_ref, mask_ref, o_ref, *, num_heads, d_head):
    # qkv_ref: (S, 3*D) bf16 (q | k | v, head-major within each), mask_ref: (1, S, S) int8.
    # The 1/sqrt(d_head) scale is already folded into the Q projection weights.
    D = num_heads * d_head
    # additive penalty: 0 where key is valid, -1e9 where masked (computed once, reused per head)
    penalty = (mask_ref[0].astype(jnp.float32) - 1.0) * 1e9

    outs = []
    for h in range(num_heads):                       # static unroll over heads
        q = qkv_ref[:, h * d_head:(h + 1) * d_head]              # (S, Dh) bf16
        k = qkv_ref[:, D + h * d_head:D + (h + 1) * d_head]      # (S, Dh) bf16
        v = qkv_ref[:, 2 * D + h * d_head:2 * D + (h + 1) * d_head]
        # scores = q @ k^T on the MXU (contract last dims, no materialized transpose), f32 out
        s = lax.dot_general(q, k, (((1,), (1,)), ((), ())),
                            preferred_element_type=jnp.float32) + penalty
        s_max = jnp.max(s, axis=-1, keepdims=True)
        p = jnp.exp(s - s_max)
        l = jnp.sum(p, axis=-1, keepdims=True)
        o = jnp.dot(p.astype(v.dtype), v, preferred_element_type=jnp.float32)
        o = o * pl.reciprocal(l, approx=True)        # EUP reciprocal instead of S^2 divides
        outs.append(o.astype(o_ref.dtype))
    # single lane-dense (S, D) store (no per-head masked partial stores, no transpose-back)
    o_ref[...] = jnp.concatenate(outs, axis=-1)


def attention(qkv2, mask_i8, *, batch, seq, num_heads, d_head, out_dtype):
    """qkv2: (B*S, 3*D) bf16; mask_i8: (B, S, S) int8 (1 keep / 0 masked) -> (B*S, D)."""
    # TODO(synk): for long sequences (S >~ 2k) this should become a KV-tiled online-softmax
    # (flash) kernel; the full-S per-batch working set is sized for v7x's 64 MiB VMEM here.
    D = num_heads * d_head
    in_sz = jnp.dtype(qkv2.dtype).itemsize
    o_sz = jnp.dtype(out_dtype).itemsize
    est = (2 * (seq * 3 * D * in_sz + seq * seq * 1 + seq * D * o_sz)
           + 4 * seq * seq * 4 + 2 * seq * D * 4 + (4 << 20))

    kernel = functools.partial(_attention_kernel, num_heads=num_heads, d_head=d_head)
    return pl.pallas_call(
        kernel,
        out_shape=jax.ShapeDtypeStruct((batch * seq, D), out_dtype),
        grid_spec=pltpu.PrefetchScalarGridSpec(
            num_scalar_prefetch=0,
            grid=(batch,),
            in_specs=[
                pl.BlockSpec((seq, 3 * D), lambda b: (b, 0)),     # this batch's QKV rows
                pl.BlockSpec((1, seq, seq), lambda b: (b, 0, 0)), # this batch's mask
            ],
            out_specs=pl.BlockSpec((seq, D), lambda b: (b, 0)),
        ),
        compiler_params=pltpu.CompilerParams(
            dimension_semantics=("parallel",),
            vmem_limit_bytes=_vmem_limit(est),
        ),
    )(qkv2, mask_i8)


# ----------------------------------------------------------------------------
# EncoderBlock forward (Pallas) and pure-JAX reference
# ----------------------------------------------------------------------------
def encoder_block_forward(x, mask_bool, params, *, num_heads,
                          compute_dtype=jnp.bfloat16):
    B, S, D = x.shape
    H = num_heads
    Dh = D // H
    assert D % H == 0

    x2 = x.reshape(B * S, D)
    x2c = x2.astype(compute_dtype)                    # bf16 activations between kernels

    # Fold the attention scale 1/sqrt(Dh) into the Q projection (zero runtime cost) and
    # pre-cast all weights to bf16 once so kernels see native MXU operands (f32 accum).
    scale = 1.0 / math.sqrt(Dh)
    wqkv_t = jnp.concatenate(
        [params["wq_t"] * scale, params["wk_t"], params["wv_t"]], axis=1
    ).astype(compute_dtype)                                           # (D, 3D)
    bqkv = jnp.concatenate([params["bq"] * scale, params["bk"], params["bv"]])  # f32 (3D,)
    wo_t = params["wo_t"].astype(compute_dtype)
    w1_t = params["w1_t"].astype(compute_dtype)
    w2_t = params["w2_t"].astype(compute_dtype)

    # boolean key mask -> int8 (4x less DMA than an f32 additive mask)
    mask_i8 = mask_bool.reshape(B, S, S).astype(jnp.int8)

    # --- multi-head self-attention ---
    qkv = linear(x2c, wqkv_t, bqkv)                                   # (B*S, 3D) bf16, fused QKV
    attn2 = attention(qkv, mask_i8, batch=B, seq=S, num_heads=H, d_head=Dh,
                      out_dtype=compute_dtype)                        # (B*S, D) bf16, no transposes

    # TODO(synk): nn.Dropout is eval-mode identity here; training-mode dropout would use
    # pltpu.prng_seed / prng_random_bits inside the fused epilogue kernels.

    # output projection + residual + LayerNorm fused
    h1 = linear_add_ln(attn2, wo_t, params["bo"], x2c,
                       params["ln1_g"], params["ln1_b"])              # (B*S, D) bf16

    # --- feed-forward ---
    ff1 = linear(h1, w1_t, params["b1"], activation="relu")           # (B*S, d_ff) bf16
    out = linear_add_ln(ff1, w2_t, params["b2"], h1,
                        params["ln2_g"], params["ln2_b"],
                        out_dtype=x.dtype)                            # (B*S, D) f32
    return out.reshape(B, S, D)


def _ln_ref(z, g, b, eps=1e-5):
    mean = jnp.mean(z, axis=-1, keepdims=True)
    var = jnp.mean((z - mean) ** 2, axis=-1, keepdims=True)
    return (z - mean) / jnp.sqrt(var + eps) * g + b


def encoder_block_ref(x, mask_bool, params, *, num_heads):
    B, S, D = x.shape
    H = num_heads
    Dh = D // H

    def lin(t, w_t, b):
        return t @ w_t + b

    def split_heads(t):
        return t.reshape(B, S, H, Dh).transpose(0, 2, 1, 3)

    q = split_heads(lin(x, params["wq_t"], params["bq"]))
    k = split_heads(lin(x, params["wk_t"], params["bk"]))
    v = split_heads(lin(x, params["wv_t"], params["bv"]))
    scores = jnp.einsum("bhqd,bhkd->bhqk", q, k) / math.sqrt(Dh)
    scores = jnp.where(mask_bool, scores, -1e9)
    p = jax.nn.softmax(scores, axis=-1)
    attn = jnp.einsum("bhqk,bhkd->bhqd", p, v).transpose(0, 2, 1, 3).reshape(B, S, D)
    attn_out = lin(attn, params["wo_t"], params["bo"])
    h1 = _ln_ref(x + attn_out, params["ln1_g"], params["ln1_b"])
    ff = lin(jnp.maximum(lin(h1, params["w1_t"], params["b1"]), 0.0),
             params["w2_t"], params["b2"])
    return _ln_ref(h1 + ff, params["ln2_g"], params["ln2_b"])


def init_encoder_block_params(key, d_model, num_heads, d_ff, dtype=jnp.float32):
    """nn.Linear default init U(-1/sqrt(fan_in), 1/sqrt(fan_in)); LN gamma=1, beta=0."""
    keys = jax.random.split(key, 12)

    def linear_init(kw, kb, fan_in, fan_out):
        bound = 1.0 / math.sqrt(fan_in)
        w_t = jax.random.uniform(kw, (fan_in, fan_out), dtype, -bound, bound)
        b = jax.random.uniform(kb, (fan_out,), dtype, -bound, bound)
        return w_t, b

    wq_t, bq = linear_init(keys[0], keys[1], d_model, d_model)
    wk_t, bk = linear_init(keys[2], keys[3], d_model, d_model)
    wv_t, bv = linear_init(keys[4], keys[5], d_model, d_model)
    wo_t, bo = linear_init(keys[6], keys[7], d_model, d_model)
    w1_t, b1 = linear_init(keys[8], keys[9], d_model, d_ff)
    w2_t, b2 = linear_init(keys[10], keys[11], d_ff, d_model)
    return dict(
        wq_t=wq_t, bq=bq, wk_t=wk_t, bk=bk, wv_t=wv_t, bv=bv, wo_t=wo_t, bo=bo,
        w1_t=w1_t, b1=b1, w2_t=w2_t, b2=b2,
        ln1_g=jnp.ones((d_model,), dtype), ln1_b=jnp.zeros((d_model,), dtype),
        ln2_g=jnp.ones((d_model,), dtype), ln2_b=jnp.zeros((d_model,), dtype),
    )


if __name__ == "__main__":
    batch, seq, d_model, num_heads, d_ff = 2, 8, 32, 4, 64

    key = jax.random.PRNGKey(0)
    kx, kp = jax.random.split(key)

    x = jax.random.normal(kx, (batch, seq, d_model), dtype=jnp.float32)

    # Padding mask: batch 0 fully valid, batch 1 has 5 valid key positions.
    lengths = jnp.array([seq, 5], dtype=jnp.int32)
    key_valid = jnp.arange(seq)[None, :] < lengths[:, None]            # (B, S)
    mask_bool = jnp.broadcast_to(key_valid[:, None, None, :],
                                 (batch, 1, seq, seq))                 # (B, 1, S, S)

    params = init_encoder_block_params(kp, d_model, num_heads, d_ff)

    y = encoder_block_forward(x, mask_bool, params, num_heads=num_heads)
    jax.block_until_ready(y)

    y_ref = encoder_block_ref(x, mask_bool, params, num_heads=num_heads)
    assert y.shape == (batch, seq, d_model)
    # Tolerances are loosened vs. the old all-f32 path because the MXU now runs on bf16
    # operands (weights + inter-kernel activations); this is an expected precision change.
    err = float(jnp.max(jnp.abs(y.astype(jnp.float32) - y_ref)))
    assert jnp.allclose(y, y_ref, atol=5e-2, rtol=5e-2), err

    print("KERNEL_OK")
</pallas_src>

<mosaic_0001>
module attributes {stable_mosaic.version = 11 : i64} {
  func.func @_matmul_bias_kernel(%arg0: i32, %arg1: i32, %arg2: i32, %arg3: memref<16x32xbf16, #tpu.memory_space<vmem>>, %arg4: memref<32x96xbf16, #tpu.memory_space<vmem>>, %arg5: memref<1x96xf32, #tpu.memory_space<vmem>>, %arg6: memref<16x96xbf16, #tpu.memory_space<vmem>>, %arg7: memref<16x96xf32, #tpu.memory_space<vmem>>) attributes {dimension_semantics = [#tpu.dimension_semantics<parallel>, #tpu.dimension_semantics<parallel>, #tpu.dimension_semantics<arbitrary>], iteration_bounds = array<i64: 1, 1, 1>, scalar_prefetch = 0 : i64, scratch_operands = 1 : i64, tpu.core_type = #tpu.core_type<tc>, window_params = [{transform_indices = @transform_0, window_bounds = array<i64: 16, 32>}, {transform_indices = @transform_1, window_bounds = array<i64: 32, 96>}, {transform_indices = @transform_2, window_bounds = array<i64: 1, 96>}, {transform_indices = @transform_3, window_bounds = array<i64: 16, 96>}]} {
    %c0_i32 = arith.constant 0 : i32
    %0 = arith.cmpi eq, %arg2, %c0_i32 : i32
    %1 = arith.extui %0 : i1 to i32
    %c0_i32_0 = arith.constant 0 : i32
    %2 = arith.cmpi ne, %1, %c0_i32_0 : i32
    scf.if %2 {
      %cst_10 = arith.constant 0.000000e+00 : f32
      %12 = vector.broadcast %cst_10 : f32 to vector<16x96xf32>
      %c0_11 = arith.constant 0 : index
      %c0_12 = arith.constant 0 : index
      %13 = vector.load %arg7[%c0_11, %c0_12] : memref<16x96xf32, #tpu.memory_space<vmem>>, vector<16x96xf32>
      tpu.vector_store %arg7[%c0_11, %c0_12], %12 {strides = array<i32>} : memref<16x96xf32, #tpu.memory_space<vmem>>, vector<16x96xf32>,
    } else {
    }
    %c0 = arith.constant 0 : index
    %c0_1 = arith.constant 0 : index
    %3 = vector.load %arg7[%c0, %c0_1] : memref<16x96xf32, #tpu.memory_space<vmem>>, vector<16x96xf32>
    %c0_2 = arith.constant 0 : index
    %c0_3 = arith.constant 0 : index
    %4 = vector.load %arg3[%c0_2, %c0_3] : memref<16x32xbf16, #tpu.memory_space<vmem>>, vector<16x32xbf16>
    %c0_4 = arith.constant 0 : index
    %c0_5 = arith.constant 0 : index
    %5 = vector.load %arg4[%c0_4, %c0_5] : memref<32x96xbf16, #tpu.memory_space<vmem>>, vector<32x96xbf16>
    %cst = arith.constant dense<0.000000e+00> : vector<16x96xf32>
    %6 = tpu.matmul %4, %5, %cst {dimension_numbers = #tpu.dot_dimension_numbers<[1], [0], [0], [1], [0, 0, 1, 1], [], []>} : vector<16x32xbf16>, vector<32x96xbf16>, vector<16x96xf32> -> vector<16x96xf32>
    %7 = arith.addf %3, %6 : vector<16x96xf32>
    %c0_6 = arith.constant 0 : index
    %c0_7 = arith.constant 0 : index
    %8 = vector.load %arg7[%c0_6, %c0_7] : memref<16x96xf32, #tpu.memory_space<vmem>>, vector<16x96xf32>
    tpu.vector_store %arg7[%c0_6, %c0_7], %7 {strides = array<i32>} : memref<16x96xf32, #tpu.memory_space<vmem>>, vector<16x96xf32>,
    %c0_i32_8 = arith.constant 0 : i32
    %9 = arith.cmpi eq, %arg2, %c0_i32_8 : i32
    %10 = arith.extui %9 : i1 to i32
    %c0_i32_9 = arith.constant 0 : i32
    %11 = arith.cmpi ne, %10, %c0_i32_9 : i32
    scf.if %11 {
      %c0_10 = arith.constant 0 : index
      %c0_11 = arith.constant 0 : index
      %12 = vector.load %arg7[%c0_10, %c0_11] : memref<16x96xf32, #tpu.memory_space<vmem>>, vector<16x96xf32>
      %c0_12 = arith.constant 0 : index
      %c0_13 = arith.constant 0 : index
      %13 = vector.load %arg5[%c0_12, %c0_13] : memref<1x96xf32, #tpu.memory_space<vmem>>, vector<1x96xf32>
      %14 = vector.broadcast %13 : vector<1x96xf32> to vector<16x96xf32>
      %15 = arith.addf %12, %14 : vector<16x96xf32>
      %16 = arith.truncf %15 : vector<16x96xf32> to vector<16x96xbf16>
      %c0_14 = arith.constant 0 : index
      %c0_15 = arith.constant 0 : index
      %17 = vector.load %arg6[%c0_14, %c0_15] : memref<16x96xbf16, #tpu.memory_space<vmem>>, vector<16x96xbf16>
      tpu.vector_store %arg6[%c0_14, %c0_15], %16 {strides = array<i32>} : memref<16x96xbf16, #tpu.memory_space<vmem>>, vector<16x96xbf16>,
    } else {
    }
    return
  }
  func.func @transform_0(%arg0: i32, %arg1: i32, %arg2: i32) -> (i32, i32) {
    %c0_i32 = arith.constant 0 : i32
    return %arg1, %arg2 : i32, i32
  }
  func.func @transform_1(%arg0: i32, %arg1: i32, %arg2: i32) -> (i32, i32) {
    %c0_i32 = arith.constant 0 : i32
    return %arg2, %arg0 : i32, i32
  }
  func.func @transform_2(%arg0: i32, %arg1: i32, %arg2: i32) -> (i32, i32) {
    %c0_i32 = arith.constant 0 : i32
    %c0_i32_0 = arith.constant 0 : i32
    return %c0_i32, %arg0 : i32, i32
  }
  func.func @transform_3(%arg0: i32, %arg1: i32, %arg2: i32) -> (i32, i32) {
    %c0_i32 = arith.constant 0 : i32
    return %arg1, %arg0 : i32, i32
  }
}

</mosaic_0001>

<bundles_post_ra>
// kernel: tpu_custom_call.1
= control target key start
LH: loop header
LB: loop body
LE: loop exit
PB: predicated region body
PF: predicated region fallthrough
CT: control target
= control target key end

     0   :  { %8 = vsyncpa [#allocation4], 0  ;;  %s317_s0 = inlined_call_operand.hbm [shape: bf16[16,32], index: 0, kind: input, shape index: {}]   ;;  %s318_s1 = inlined_call_operand.hbm [shape: bf16[32,96], index: 1, kind: input, shape index: {}]   ;;  %s319_s2 = inlined_call_operand.vmem [shape: f32[1,96], index: 2, kind: input, shape index: {}]   ;;  %s320_s3 = inlined_call_operand.hbm [shape: bf16[16,96], index: 3, kind: output, shape index: {}]  }
   0x1   :  { %9 = vsyncpa [#allocation7], 0 }
   0x2   :  { %10 = vsyncpa [#allocation5], 0  ;;  %s265_s12 = smov [#allocation3]  }
   0x3   :  { %s16_s13 = sshll.u32 %s265_s12, 4  ;;  %s17_s13 = int_to_ptr.vmem [resolvable:$true] %s16_s13 }
   0x4   :  { %s207_s14 = scalar_lea.vmem %s17_s13, 128  ;;  %p212_p1 = scmp.lt.s32.totalorder %s17_s13, %s17_s13 }
   0x5   :  { %p208_p0 = scmp.ne.s32.totalorder %s17_s13, %s207_s14  ;;  %p213_p2 = scmp.lt.s32.totalorder %s207_s14, %s207_s14 }
   0x7   :  { %p214_p3 = por %p213_p2, %p212_p1 }
   0x9   :  { %p215_p4 = pnand %p214_p3, %p208_p0 }
   0xb   :  { %218 = shalt.err (!%p215_p4)
}
   0xc   :  { %s266_s15 = smov 64   ;;  %s267_s16 = smov 4  }
   0xd   :  { %22 = dma.hbm_to_vmem [thread:$0]  %s317_s0, 128, %s17_s13, [#allocation4], %s266_s15, %s266_s15, %s267_s16  }
   0xe   :  { %s268_s19 = smov [#allocation6]  }
   0xf   :  { %s28_s20 = sshll.u32 %s268_s19, 4  ;;  %s29_s20 = int_to_ptr.vmem [resolvable:$true] %s28_s20 }
  0x10   :  { %s227_s21 = scalar_lea.vmem %s29_s20, 256  ;;  %p232_p6 = scmp.lt.s32.totalorder %s29_s20, %s29_s20 }
  0x11   :  { %p228_p5 = scmp.ne.s32.totalorder %s29_s20, %s227_s21  ;;  %p233_p7 = scmp.lt.s32.totalorder %s227_s21, %s227_s21 }
  0x13   :  { %p234_p8 = por %p233_p7, %p232_p6 }
  0x15   :  { %p235_p9 = pnand %p234_p8, %p228_p5 }
  0x17   :  { %238 = shalt.err (!%p235_p9)
}
  0x18   :  { %34 = dma.hbm_to_vmem [thread:$0]  %s318_s1, 256, %s29_s20, [#allocation7], %s266_s15, %s266_s15, %s267_s16  }
  0x19   :  { %259 = dma.done.wait [#allocation4], 128  }
  0x1a   :  { %260 = vsyncadd [#allocation4], 4294967168 }
  0x1b   :  { %261 = dma.done.wait [#allocation7], 256  }
  0x1c   :  { %262 = vsyncadd [#allocation7], 4294967040  ;;  %vm48_vm0 = vcmask 785408   ;;  %v269_v0 = vmov 0.0   ;;  %vm270_vm1 = vmmov 0   ;;  %v196_v1 = vld [vmem:[#allocation6 + $0x8] sm:$0xff]  }
  0x1d   :  { %49 = vst.msk [vmem:[#allocation2] sm:$0xff] %vm48_vm0, %v269_v0  ;;  %50 = vst.msk [vmem:[#allocation2 + $0x8] sm:$0xff] %vm48_vm0, %v269_v0  ;;  %181 = vmatprep.subr.bf16.mxu0 %v269_v0  ;;  %185 = vmatprep.mubr.msk.bf16.mxu0 %vm270_vm1, %v269_v0  ;;  %v197_v2 = vld [vmem:[#allocation6] sm:$0xff]   ;;  %v198_v3 = vld [vmem:[#allocation3] sm:$0xff]   ;;  %vm76_vm2 = vcmask 261120   ;;  %vm148_vm3 = vcmask 781312  }
  0x1e   :  { %182 = vmatpush3.bf16.msra.mxu0 %v196_v1  ;;  %v173_v12 = vld [vmem:[%s319_s2] ss:$0 sm:$0xff]  ;;  %s271_s24 = smov [#allocation8]  }
  0x1f   :  { %183 = vmatprep.subr.bf16.mxu0 %v269_v0  ;;  %s156_s25 = sshll.u32 %s271_s24, 4  ;;  %s157_s25 = int_to_ptr.vmem [resolvable:$true] %s156_s25 }
  0x20   :  { %s239_s26 = scalar_lea.vmem %s157_s25, 128  ;;  %p244_p11 = scmp.lt.s32.totalorder %s157_s25, %s157_s25 }
  0x21   :  { %p240_p10 = scmp.ne.s32.totalorder %s157_s25, %s239_s26  ;;  %p245_p12 = scmp.lt.s32.totalorder %s239_s26, %s239_s26 }
  0x22   :  { %184 = vmatpush3.bf16.msra.mxu0 %v197_v2 }
  0x23   :  { %p246_p13 = por %p245_p12, %p244_p11 }
  0x24   :  { %v51_v4 = vld [vmem:[#allocation2] sm:$0xff]  ;;  %v52_v8 = vld [vmem:[#allocation2 + $0x8] sm:$0xff] }
  0x25   :  { %186 = vmatmul.mubr.msk.bf16.vlgmr.msra.gmra.mxu0 %vm76_vm2, %v198_v3  ;;  %p247_p0 = pnand %p246_p13, %p240_p10 }
  0xe5   :  { %v114_v5 = vpop.f32.mrf.mxu0 }
  0xe6   :  { %v121_v6 = vadd.f32 %v114_v5, %v51_v4 }
  0xe7   :  { %v187_v7 = vpop.f32.mrf.mxu0 }
  0xe8   :  { %124 = vst.msk [vmem:[#allocation2] sm:$0xff] %vm48_vm0, %v121_v6 }
  0xe9   :  { %v117_v9 = vpop.f32.mrf.mxu0 }
  0xea   :  { %v122_v10 = vadd.f32 %v117_v9, %v52_v8 }
  0xeb   :  { %v188_v11 = vpop.f32.mrf.mxu0 }
  0xec   :  { %125 = vst.msk [vmem:[#allocation2 + $0x8] sm:$0xff] %vm48_vm0, %v122_v10 }
  0xef   :  { %v129_v13 = vld [vmem:[#allocation2] sm:$0xff] }
  0xf0   :  { %v138_v14 = vadd.f32 %v173_v12, %v129_v13 }
  0xf2   :  { %v176_v15 = vpack.c.bf16 %v138_v14, %v138_v14 }
  0xf3   :  { %v130_v16 = vld [vmem:[#allocation2 + $0x8] sm:$0xff] }
  0xf4   :  { %v139_v17 = vadd.f32 %v173_v12, %v130_v16  ;;  %149 = vst.msk [vmem:[#allocation8] sm:$0xf] %vm148_vm3, %v176_v15 }
  0xf6   :  { %v177_v18 = vpack.c.bf16 %v139_v17, %v139_v17 }
  0xf8   :  { %150 = vst.msk [vmem:[#allocation8 + $0x4] sm:$0xf] %vm148_vm3, %v177_v18 }
  0xf9   :  { %250 = shalt.err (!%p247_p0)
}
  0xfa   :  { %162 = dma.vmem_to_hbm [thread:$0]  %s157_s25, 128, %s320_s3, [#allocation5], %s266_s15, %s266_s15, %s267_s16  }
  0xfb   :  { %263 = dma.done.wait [#allocation5], 128  }
  0xfc   :  { %264 = vsyncadd [#allocation5], 4294967168 }
  0xfd   :  { %166 = vsyncpa [#allocation4], 1 }
  0xfe   :  { %167 = vsyncpa [#allocation7], 1 }
  0xff   :  { %168 = vsyncpa [#allocation5], 1 }

</bundles_post_ra>
